<compile_context>
chip_gen: v6e
topology: v6e:2x2x1
jax: 0.10.0
libtpu: 0.0.40
codegen_flags: <defaults>
</compile_context>

<pallas_src>
import functools
import math

import jax
import jax.numpy as jnp
from jax.experimental import pallas as pl
from jax.experimental.pallas import tpu as pltpu


# ---------------------------------------------------------------------------
# Kernel body (rank-agnostic: handles (ts, B, D) blocks and (ts, B*D) blocks).
# ---------------------------------------------------------------------------
def _pos_enc_kernel(seed_ref, emb_ref, pe_ref, o_ref, *,
                    scale, dropout_p, b_tile, seq_tile):
    pe = pe_ref[...]
    if b_tile > 1:
        # Flattened (ts, B*D) path: replicate the (rows, D) pe slice across the
        # batch fold in VMEM (free for a memory-bound kernel) instead of
        # materializing a full S*B*D copy in HBM.
        pe = jnp.tile(pe, (1, b_tile))

    # scale == sqrt(D)/(1-p) and pe is pre-scaled by 1/(1-p) in the wrapper,
    # so kept values already carry the inverted-dropout rescale.
    x = emb_ref[...] * scale + pe

    if dropout_p > 0.0:
        # Counter-based hash PRNG: plain integer VPU ops, lowers on TPU and in
        # interpret mode (unlike pltpu.prng_*).  Bits depend only on
        # (seed, global element position) -> mask is tile-size independent.
        shape = x.shape
        seq_base = pl.program_id(0) * seq_tile
        if len(shape) == 3:
            _, bb, dd = shape
            s_idx = jax.lax.broadcasted_iota(jnp.int32, shape, 0) + seq_base
            b_idx = jax.lax.broadcasted_iota(jnp.int32, shape, 1)
            d_idx = jax.lax.broadcasted_iota(jnp.int32, shape, 2)
            flat = (s_idx * bb + b_idx) * dd + d_idx
        else:
            _, ww = shape
            s_idx = jax.lax.broadcasted_iota(jnp.int32, shape, 0) + seq_base
            w_idx = jax.lax.broadcasted_iota(jnp.int32, shape, 1)
            flat = s_idx * ww + w_idx

        u = flat.astype(jnp.uint32) + seed_ref[0].astype(jnp.uint32) * jnp.uint32(0x9E3779B9)
        # 32-bit finalizer (Wellons "lowbias32"): good avalanche on counters.
        u = u ^ (u >> 16)
        u = u * jnp.uint32(0x7FEB352D)
        u = u ^ (u >> 15)
        u = u * jnp.uint32(0x846CA68B)
        u = u ^ (u >> 16)
        # Keep iff bits >= p * 2^32 (unsigned compare => P[keep] = 1 - p).
        thresh = jnp.uint32(min(int(dropout_p * 4294967296.0), 4294967295))
        x = jnp.where(u >= thresh, x, jnp.zeros_like(x))

    o_ref[...] = x.astype(o_ref.dtype)


# ---------------------------------------------------------------------------
# Sinusoidal table (identical to the PyTorch __init__ construction).
# ---------------------------------------------------------------------------
def make_pe_table(dim, max_len=5000, dtype=jnp.float32):
    position = jnp.arange(max_len, dtype=jnp.float32)[:, None]            # (L, 1)
    div_term = jnp.exp(
        jnp.arange(0, dim, 2, dtype=jnp.float32) * -(math.log(10000.0) / dim))
    ang = position * div_term                                             # (L, D/2)
    pe = jnp.zeros((max_len, dim), jnp.float32)
    pe = pe.at[:, 0::2].set(jnp.sin(ang))
    pe = pe.at[:, 1::2].set(jnp.cos(ang))
    return pe.astype(dtype)                                               # (L, D)


_DEFAULT_BLOCK_BYTES = 4 * 1024 * 1024   # per-buffer tile target (v7x-safe)
_VMEM_LIMIT_BYTES = 48 * 1024 * 1024     # below v7x's 64 MiB physical VMEM


def _choose_seq_tile(S, row_bytes, block_bytes):
    ts = max(1, block_bytes // max(row_bytes, 1))
    ts = max(8, (ts // 8) * 8)           # sublane-aligned tile of seq rows
    if S >= 16:
        # Guarantee >= 2 roughly-even tiles so both v7x TensorCores stream;
        # one extra grid step (~0.35 us) is negligible on v5e/v6e.
        half = ((pl.cdiv(S, 2) + 7) // 8) * 8
        ts = min(ts, half)
    if ts >= S:
        ts = S                           # single tile covers everything
    return ts


def positional_encoding(emb, pe_table, *, dropout_p=0.0, step=None, seed=0,
                        seq_tile=None, block_bytes=_DEFAULT_BLOCK_BYTES):
    """Forward pass of OpenNMT PositionalEncoding.  emb: (S, B, D)."""
    S, B, D = emb.shape
    dtype = emb.dtype
    itemsize = jnp.dtype(dtype).itemsize
    inv_keep = 1.0 / (1.0 - dropout_p) if dropout_p > 0.0 else 1.0
    scale = math.sqrt(D) * inv_keep      # fold the dropout rescale into the FMA

    # Positional slice: (S, D) in normal mode; a single (1, D) resident block
    # in step mode (no broadcast_to materialization in HBM).
    if step is None:
        pe_sd = pe_table[:S, :]
    else:
        pe_sd = pe_table[step:step + 1, :]
    if inv_keep != 1.0:
        pe_sd = pe_sd * inv_keep         # tiny array: fold 1/(1-p) here
    pe_sd = pe_sd.astype(dtype)
    pe_rows = pe_sd.shape[0]

    seed_arr = jnp.array([seed], dtype=jnp.int32)
    row_bytes = B * D * itemsize
    ts = seq_tile if seq_tile is not None else _choose_seq_tile(S, row_bytes, block_bytes)
    ts = min(ts, S)
    num_tiles = pl.cdiv(S, ts)           # no wrapper pad: Pallas masks the ragged tail

    n = S * B * D
    cost = pl.CostEstimate(
        flops=(2 + (8 if dropout_p > 0.0 else 0)) * n,
        transcendentals=0,
        bytes_accessed=(2 * n + pe_rows * D) * itemsize,
    )
    cparams = pltpu.CompilerParams(
        dimension_semantics=("parallel",),       # megacore-shardable on v7x
        vmem_limit_bytes=_VMEM_LIMIT_BYTES,
    )
    smem_spec = pl.BlockSpec(memory_space=pltpu.MemorySpace.SMEM)

    if D % 128 == 0:
        # Lane-dense 3-D path: (ts, B, D) emb/out blocks; pe is a (ts, 1, D)
        # (or resident (1, 1, D) in step mode) block broadcast over B in VMEM,
        # so pe HBM traffic is 1/B of emb traffic.
        kernel = functools.partial(_pos_enc_kernel, scale=scale,
                                   dropout_p=float(dropout_p),
                                   b_tile=1, seq_tile=ts)
        if step is None:
            pe_spec = pl.BlockSpec((ts, 1, D), lambda i: (i, 0, 0))
        else:
            pe_spec = pl.BlockSpec((1, 1, D), lambda i: (0, 0, 0))
        return pl.pallas_call(
            kernel,
            out_shape=jax.ShapeDtypeStruct((S, B, D), dtype),
            grid=(num_tiles,),
            in_specs=[
                smem_spec,                                        # seed
                pl.BlockSpec((ts, B, D), lambda i: (i, 0, 0)),    # emb tile
                pe_spec,                                          # pe tile
            ],
            out_specs=pl.BlockSpec((ts, B, D), lambda i: (i, 0, 0)),
            compiler_params=cparams,
            cost_estimate=cost,
        )(seed_arr, emb, pe_sd[:, None, :])

    # Fallback (D not lane-aligned): flatten to (S, B*D) so stores are as
    # lane-dense as the shape allows (free reshape of a contiguous array);
    # pe streams as (ts, D) blocks and is tiled across B inside the kernel.
    emb2 = emb.reshape(S, B * D)
    kernel = functools.partial(_pos_enc_kernel, scale=scale,
                               dropout_p=float(dropout_p),
                               b_tile=B, seq_tile=ts)
    if step is None:
        pe_spec = pl.BlockSpec((ts, D), lambda i: (i, 0))
    else:
        pe_spec = pl.BlockSpec((1, D), lambda i: (0, 0))
    out = pl.pallas_call(
        kernel,
        out_shape=jax.ShapeDtypeStruct((S, B * D), dtype),
        grid=(num_tiles,),
        in_specs=[
            smem_spec,                                            # seed
            pl.BlockSpec((ts, B * D), lambda i: (i, 0)),          # emb tile
            pe_spec,                                              # pe tile
        ],
        out_specs=pl.BlockSpec((ts, B * D), lambda i: (i, 0)),
        compiler_params=cparams,
        cost_estimate=cost,
    )(seed_arr, emb2, pe_sd)
    return out.reshape(S, B, D)


if __name__ == "__main__":
    key = jax.random.PRNGKey(0)
    k1, k2, k3 = jax.random.split(key, 3)

    pe_small = make_pe_table(32, max_len=5000)
    pe_big = make_pe_table(128, max_len=5000)

    # --- Case 1: small D -> flattened lane-dense path (eval mode). ----------
    S1, B1, D1 = 8, 2, 32
    emb1 = jax.random.normal(k1, (S1, B1, D1), dtype=jnp.float32)
    out1 = jax.block_until_ready(positional_encoding(emb1, pe_small, dropout_p=0.0))
    ref1 = emb1 * math.sqrt(D1) + pe_small[:S1][:, None, :]
    assert out1.shape == (S1, B1, D1)
    assert jnp.allclose(out1, ref1, atol=1e-5, rtol=1e-5)

    # --- Case 2: dense 3-D path, two parallel seq tiles. ---------------------
    S2, B2, D2 = 16, 8, 128
    emb2 = jax.random.normal(k2, (S2, B2, D2), dtype=jnp.float32)
    out2 = jax.block_until_ready(
        positional_encoding(emb2, pe_big, dropout_p=0.0, seq_tile=8))
    ref2 = emb2 * math.sqrt(D2) + pe_big[:S2][:, None, :]
    assert jnp.allclose(out2, ref2, atol=1e-5, rtol=1e-5)

    # --- Case 3: step mode (decode): resident (1, D) pe block. ---------------
    out3 = jax.block_until_ready(
        positional_encoding(emb1, pe_small, dropout_p=0.0, step=3))
    ref3 = emb1 * math.sqrt(D1) + pe_small[3][None, None, :]
    assert jnp.allclose(out3, ref3, atol=1e-5, rtol=1e-5)

    # --- Case 4: ragged S (no wrapper pad; Pallas masks the partial block). --
    S4 = 12
    emb4 = jax.random.normal(k3, (S4, B2, D2), dtype=jnp.float32)
    out4 = jax.block_until_ready(
        positional_encoding(emb4, pe_big, dropout_p=0.0, seq_tile=8))
    ref4 = emb4 * math.sqrt(D2) + pe_big[:S4][:, None, :]
    assert out4.shape == (S4, B2, D2)
    assert jnp.allclose(out4, ref4, atol=1e-5, rtol=1e-5)

    # --- Case 5: dropout (training mode). ------------------------------------
    # TODO(synk): torch.nn.Dropout's exact RNG stream is not reproducible; we
    # use a counter-based hash PRNG with the same keep probability and rescale.
    p = 0.3
    out5 = jax.block_until_ready(
        positional_encoding(emb1, pe_small, dropout_p=p, seed=123))
    scaled_ref = ref1 / (1.0 - p)
    kept = out5 != 0.0
    ok = jnp.where(kept,
                   jnp.abs(out5 - scaled_ref) < 1e-3 * (1.0 + jnp.abs(scaled_ref)),
                   True)
    assert bool(jnp.all(ok))
    frac = float(jnp.mean(kept.astype(jnp.float32)))
    assert 0.35 <= frac <= 0.98, f"implausible keep fraction {frac}"

    # --- Case 6: ragged S + dropout: masked tail stores, no NaNs leak out. ---
    out6 = jax.block_until_ready(
        positional_encoding(emb4, pe_big, dropout_p=p, seed=7, seq_tile=8))
    scaled_ref6 = ref4 / (1.0 - p)
    kept6 = out6 != 0.0
    ok6 = jnp.where(kept6,
                    jnp.abs(out6 - scaled_ref6) < 1e-3 * (1.0 + jnp.abs(scaled_ref6)),
                    True)
    assert bool(jnp.all(ok6))
    assert not bool(jnp.any(jnp.isnan(out6)))
    frac6 = float(jnp.mean(kept6.astype(jnp.float32)))
    assert 0.45 <= frac6 <= 0.9, f"implausible keep fraction {frac6}"

    print("KERNEL_OK")
</pallas_src>

<mosaic_0001>
module attributes {stable_mosaic.version = 11 : i64} {
  func.func @_pos_enc_kernel(%arg0: i32, %arg1: memref<1xi32, #tpu.memory_space<smem>>, %arg2: memref<8x64xf32, #tpu.memory_space<vmem>>, %arg3: memref<8x32xf32, #tpu.memory_space<vmem>>, %arg4: memref<8x64xf32, #tpu.memory_space<vmem>>) attributes {dimension_semantics = [#tpu.dimension_semantics<parallel>], iteration_bounds = array<i64: 1>, scalar_prefetch = 0 : i64, scratch_operands = 0 : i64, tpu.core_type = #tpu.core_type<tc>, window_params = [{transform_indices = @transform_0, window_bounds = array<i64: 1>}, {transform_indices = @transform_1, window_bounds = array<i64: 8, 64>}, {transform_indices = @transform_2, window_bounds = array<i64: 8, 32>}, {transform_indices = @transform_3, window_bounds = array<i64: 8, 64>}]} {
    %c0 = arith.constant 0 : index
    %c0_0 = arith.constant 0 : index
    %0 = vector.load %arg3[%c0, %c0_0] : memref<8x32xf32, #tpu.memory_space<vmem>>, vector<8x32xf32>
    %1 = tpu.concatenate %0, %0 in 1 : vector<8x32xf32>, vector<8x32xf32> -> vector<8x64xf32>
    %c0_1 = arith.constant 0 : index
    %c0_2 = arith.constant 0 : index
    %2 = vector.load %arg2[%c0_1, %c0_2] : memref<8x64xf32, #tpu.memory_space<vmem>>, vector<8x64xf32>
    %cst = arith.constant 5.65685415 : f32
    %3 = vector.broadcast %cst : f32 to vector<8x64xf32>
    %4 = arith.mulf %2, %3 : vector<8x64xf32>
    %5 = arith.addf %4, %1 : vector<8x64xf32>
    %c0_3 = arith.constant 0 : index
    %c0_4 = arith.constant 0 : index
    %6 = vector.load %arg4[%c0_3, %c0_4] : memref<8x64xf32, #tpu.memory_space<vmem>>, vector<8x64xf32>
    tpu.vector_store %arg4[%c0_3, %c0_4], %5 {strides = array<i32>} : memref<8x64xf32, #tpu.memory_space<vmem>>, vector<8x64xf32>,
    return
  }
  func.func @transform_0(%arg0: i32) -> i32 {
    %c0_i32 = arith.constant 0 : i32
    %c0_i32_0 = arith.constant 0 : i32
    return %c0_i32 : i32
  }
  func.func @transform_1(%arg0: i32) -> (i32, i32) {
    %c0_i32 = arith.constant 0 : i32
    %c0_i32_0 = arith.constant 0 : i32
    return %arg0, %c0_i32 : i32, i32
  }
  func.func @transform_2(%arg0: i32) -> (i32, i32) {
    %c0_i32 = arith.constant 0 : i32
    %c0_i32_0 = arith.constant 0 : i32
    return %arg0, %c0_i32 : i32, i32
  }
  func.func @transform_3(%arg0: i32) -> (i32, i32) {
    %c0_i32 = arith.constant 0 : i32
    %c0_i32_0 = arith.constant 0 : i32
    return %arg0, %c0_i32 : i32, i32
  }
}

</mosaic_0001>

<bundles_post_ra>
// kernel: tpu_custom_call.1
= control target key start
LH: loop header
LB: loop body
LE: loop exit
PB: predicated region body
PF: predicated region fallthrough
CT: control target
= control target key end

     0   :  { %9 = vsyncpa [#allocation4], 0  ;;  %s171_s0 = inlined_call_operand.<no memory space> [shape: s32[1], index: 0, kind: input, shape index: {}]   ;;  %s172_s1 = inlined_call_operand.hbm [shape: f32[8,64], index: 1, kind: input, shape index: {}]   ;;  %s173_s2 = inlined_call_operand.hbm [shape: f32[8,32], index: 2, kind: input, shape index: {}]   ;;  %s174_s3 = inlined_call_operand.hbm [shape: f32[8,64], index: 3, kind: output, shape index: {}]  }
   0x1   :  { %10 = vsyncpa [#allocation7], 0 }
   0x2   :  { %11 = vsyncpa [#allocation5], 0  ;;  %s138_s12 = smov [#allocation3]   ;;  %s139_s14 = smov [#allocation6]  }
   0x3   :  { %s20_s13 = sshll.u32 %s138_s12, 4  ;;  %s30_s15 = sshll.u32 %s139_s14, 4  ;;  %s21_s13 = int_to_ptr.vmem [resolvable:$true] %s20_s13  ;;  %s31_s15 = int_to_ptr.vmem [resolvable:$true] %s30_s15 }
   0x4   :  { %s80_s16 = scalar_lea.vmem %s21_s13, 128  ;;  %p85_p1 = scmp.lt.s32.totalorder %s21_s13, %s21_s13 }
   0x5   :  { %p81_p0 = scmp.ne.s32.totalorder %s21_s13, %s80_s16  ;;  %p86_p2 = scmp.lt.s32.totalorder %s80_s16, %s80_s16 }
   0x7   :  { %p87_p3 = por %p86_p2, %p85_p1 }
   0x9   :  { %p88_p4 = pnand %p87_p3, %p81_p0 }
   0xb   :  { %91 = shalt.err (!%p88_p4)
}
   0xc   :  { %23 = dma.hbm_to_vmem [thread:$0]  %s172_s1, 128, %s21_s13, [#allocation4]  }
   0xd   :  { %s100_s18 = scalar_lea.vmem %s31_s15, 128  ;;  %p105_p6 = scmp.lt.s32.totalorder %s31_s15, %s31_s15 }
   0xe   :  { %p101_p5 = scmp.ne.s32.totalorder %s31_s15, %s100_s18  ;;  %p106_p7 = scmp.lt.s32.totalorder %s100_s18, %s100_s18 }
  0x10   :  { %p107_p8 = por %p106_p7, %p105_p6 }
  0x12   :  { %p108_p9 = pnand %p107_p8, %p101_p5 }
  0x14   :  { %111 = shalt.err (!%p108_p9)
}
  0x15   :  { %33 = dma.hbm_to_vmem [thread:$0]  %s173_s2, 128, %s31_s15, [#allocation7]  }
  0x16   :  { %132 = dma.done.wait [#allocation4], 128  }
  0x17   :  { %133 = vsyncadd [#allocation4], 4294967168 }
  0x18   :  { %134 = dma.done.wait [#allocation7], 128  }
  0x19   :  { %135 = vsyncadd [#allocation7], 4294967168  ;;  %v40_v0 = vld [vmem:[#allocation6] sm:$0xff]  ;;  %s140_s21 = smov 32   ;;  %v47_v1 = vld [vmem:[#allocation3] sm:$0xff]  ;;  %vm45_vm0 = vcmask 261120  }
  0x1a   :  { %42 = vrot.lane.b32.xlu0 %v40_v0, %s140_s21  ;;  %v48_v2 = vmul.f32 5.656854, %v47_v1  ;;  %s141_s1 = smov [#allocation8]   ;;  %vm50_vm1 = vcmask 523264  }
  0x1b   :  { %s58_s22 = sshll.u32 %s141_s1, 4  ;;  %s59_s22 = int_to_ptr.vmem [resolvable:$true] %s58_s22 }
  0x1c   :  { %s112_s23 = scalar_lea.vmem %s59_s22, 128  ;;  %p117_p11 = scmp.lt.s32.totalorder %s59_s22, %s59_s22 }
  0x1d   :  { %p113_p10 = scmp.ne.s32.totalorder %s59_s22, %s112_s23  ;;  %p118_p12 = scmp.lt.s32.totalorder %s112_s23, %s112_s23 }
  0x1f   :  { %p119_p13 = por %p118_p12, %p117_p11 }
  0x21   :  { %p120_p0 = pnand %p119_p13, %p113_p10 }
  0x8c   :  { %v43_v3 = vpop.permute.xlu0 %42 }
  0x8d   :  { %v46_v4 = vsel %vm45_vm0, %v40_v0, %v43_v3 }
  0x8e   :  { %v49_v5 = vadd.f32 %v48_v2, %v46_v4 }
  0x90   :  { %51 = vst.msk [vmem:[#allocation8] sm:$0xff] %vm50_vm1, %v49_v5 }
  0x91   :  { %123 = shalt.err (!%p120_p0)
}
  0x92   :  { %61 = dma.vmem_to_hbm [thread:$0]  %s59_s22, 128, %s174_s3, [#allocation5]  }
  0x93   :  { %136 = dma.done.wait [#allocation5], 128  }
  0x94   :  { %137 = vsyncadd [#allocation5], 4294967168 }
  0x95   :  { %65 = vsyncpa [#allocation4], 1 }
  0x96   :  { %66 = vsyncpa [#allocation7], 1 }
  0x97   :  { %67 = vsyncpa [#allocation5], 1 }

</bundles_post_ra>
